<compile_context>
chip_gen: v7x
topology: tpu7x:2x2x1
jax: 0.10.0
libtpu: 0.0.40
codegen_flags: <defaults>
</compile_context>

<pallas_src>
import jax
import jax.numpy as jnp
from jax.experimental import pallas as pl
from jax.experimental.pallas import tpu as pltpu


_VMEM_LIMIT_BYTES = 48 * 1024 * 1024  # < v7x 64 MiB physical VMEM, fine on v5e/v6e.


def _round_up(v, mult):
    return ((v + mult - 1) // mult) * mult


# ---------------------------------------------------------------------------
# Kernels
# ---------------------------------------------------------------------------

def _crelu_kernel_2d(x_ref, o_ref):
    """General path: x_ref (T, W) -> o_ref (T, 2W) = [relu(x) | relu(-x)]."""
    x = x_ref[...]
    w = x.shape[-1]
    o_ref[:, :w] = jnp.maximum(x, 0).astype(o_ref.dtype)
    o_ref[:, w:] = jnp.maximum(-x, 0).astype(o_ref.dtype)


def _make_packed_kernel(w):
    """Lane-packed path for W | 128, W < 128.

    x_ref: (T, 128) -- lane-dense view of the flattened input.
    o_ref: (T, 256) -- lane-dense view of the flattened output (same flat
                       element order as (M, 2W) row-major).

    Output lane d (0 <= d < 256) of a row belongs to chunk c = d // w:
      even c -> relu( x)[lane (c//2)*w + d%w]
      odd  c -> relu(-x)[lane (c//2)*w + d%w]
    """
    g = 128 // w  # input rows packed per 128-lane row

    def kernel(x_ref, o_ref):
        x = x_ref[...]
        rx = jnp.maximum(x, 0).astype(o_ref.dtype)
        rn = jnp.maximum(-x, 0).astype(o_ref.dtype)
        pieces = []
        for c in range(2 * g):
            src = rx if (c % 2 == 0) else rn
            s0 = (c // 2) * w
            pieces.append(src[:, s0:s0 + w])
        # In-register W-period interleave; the lane shuffles this lowers to run
        # on the XLU slot and hide under the DMA/store critical path.  The
        # resulting store is a full-width, unmasked (T, 256) store.
        o_ref[...] = jnp.concatenate(pieces, axis=-1)

    return kernel


# ---------------------------------------------------------------------------
# Wrapper / tiling
# ---------------------------------------------------------------------------

def _compiler_params(core_parallel):
    if core_parallel:
        # v7x-only knob (2 TCs/chip): CORE_PARALLEL reliably splits the row
        # grid across both TensorCores.  Off by default; "parallel" is
        # accepted on every generation.
        dims = (pltpu.CORE_PARALLEL,)
    else:
        dims = ("parallel",)
    return pltpu.CompilerParams(
        dimension_semantics=dims,
        vmem_limit_bytes=_VMEM_LIMIT_BYTES,
    )


def _pick_tile(rows, bytes_per_row, sublane, budget_bytes, tile_rows):
    """Row-tile selection: byte-budget based, with a >=2-step split for v7x."""
    if tile_rows is None:
        tile = max(sublane, budget_bytes // bytes_per_row)
        # v7x has two TensorCores per chip: when there is enough work, make
        # sure the grid has at least two steps so both cores get tiles (costs
        # one extra ~0.35us pipeline step on single-core v5e/v6e).
        if rows > 2 * sublane:
            tile = min(tile, _round_up(pl.cdiv(rows, 2), sublane))
    else:
        tile = int(tile_rows)
    if tile >= rows:
        return rows  # full-dim block is always legal
    return max(sublane, (tile // sublane) * sublane)


def _crelu_general(x2d, *, sublane, budget, tile_rows, core_parallel, cost):
    m, w = x2d.shape
    itemsize = jnp.dtype(x2d.dtype).itemsize
    lanes_in = _round_up(w, 128)
    lanes_out = _round_up(2 * w, 128)
    # Double-buffered input + output block bytes per row.
    bytes_per_row = 2 * (lanes_in + lanes_out) * itemsize
    # TODO(synk): for extremely wide rows (W beyond ~3e5 elems) add a second
    # grid axis over W (via a row-interleaved (2M, W) output view) so the
    # minimum block still fits v7x's 64 MiB VMEM.
    tile = _pick_tile(m, bytes_per_row, sublane, budget, tile_rows)
    grid = (pl.cdiv(m, tile),)
    return pl.pallas_call(
        _crelu_kernel_2d,
        out_shape=jax.ShapeDtypeStruct((m, 2 * w), x2d.dtype),
        grid_spec=pltpu.PrefetchScalarGridSpec(
            num_scalar_prefetch=0,
            grid=grid,
            in_specs=[pl.BlockSpec((tile, w), lambda i: (i, 0))],
            out_specs=pl.BlockSpec((tile, 2 * w), lambda i: (i, 0)),
        ),
        compiler_params=_compiler_params(core_parallel),
        cost_estimate=cost,
    )(x2d)


def _crelu_packed(x2d, *, sublane, budget, tile_rows, core_parallel, cost):
    m, w = x2d.shape
    itemsize = jnp.dtype(x2d.dtype).itemsize
    rows = (m * w) // 128
    x_lanes = x2d.reshape(rows, 128)  # free: contiguous row-major view
    bytes_per_row = 2 * (128 + 256) * itemsize  # double-buffered in + out
    tile = _pick_tile(rows, bytes_per_row, sublane, budget, tile_rows)
    grid = (pl.cdiv(rows, tile),)
    out = pl.pallas_call(
        _make_packed_kernel(w),
        out_shape=jax.ShapeDtypeStruct((rows, 256), x2d.dtype),
        grid_spec=pltpu.PrefetchScalarGridSpec(
            num_scalar_prefetch=0,
            grid=grid,
            in_specs=[pl.BlockSpec((tile, 128), lambda i: (i, 0))],
            out_specs=pl.BlockSpec((tile, 256), lambda i: (i, 0)),
        ),
        compiler_params=_compiler_params(core_parallel),
        cost_estimate=cost,
    )(x_lanes)
    return out.reshape(m, 2 * w)  # free: contiguous


def crelu(x, *, tile_rows=None, vmem_step_budget_bytes=20 * 1024 * 1024,
          core_parallel=False):
    """CReLU over the last axis: relu(concat([x, -x], axis=-1)).

    `tile_rows`, if given, is in units of the selected path's row dimension
    (x-rows for the general path, 128-lane rows for the packed path).
    Float dtypes only.
    """
    orig_shape = x.shape
    w = int(orig_shape[-1])
    m = 1
    for d in orig_shape[:-1]:
        m *= int(d)
    itemsize = jnp.dtype(x.dtype).itemsize
    # Sublane packing: 8 rows (4-byte), 16 (2-byte), 32 (1-byte).
    sublane = max(8, 32 // max(1, itemsize))

    x2d = x.reshape(m, w)
    cost = pl.CostEstimate(
        flops=2 * m * w,
        transcendentals=0,
        bytes_accessed=3 * m * w * itemsize,
    )
    kwargs = dict(sublane=sublane, budget=vmem_step_budget_bytes,
                  tile_rows=tile_rows, core_parallel=core_parallel, cost=cost)

    # Lane-packed path for small W dividing 128 (e.g. the NCHW spatial W=16
    # case): lane-dense DMA both ways, unpadded VMEM blocks, dense stores.
    use_packed = (8 <= w < 128) and (128 % w == 0) and m > 0 and ((m * w) % 128 == 0)

    if use_packed:
        try:
            out2d = _crelu_packed(x2d, **kwargs)
        except Exception:
            # Defensive: if this Mosaic build rejects the in-register lane
            # interleave, fall back to the (slower but proven) general path.
            out2d = _crelu_general(x2d, **kwargs)
    else:
        out2d = _crelu_general(x2d, **kwargs)

    return out2d.reshape(orig_shape[:-1] + (2 * w,))


if __name__ == "__main__":
    key = jax.random.PRNGKey(0)
    k0, k1, k2 = jax.random.split(key, 3)

    # 1) PyTorch conv-style NCHW input (batch=2, channels=4, spatial=16x16):
    #    W=16 -> lane-packed path.
    x = jax.random.normal(k0, (2, 4, 16, 16), dtype=jnp.float32)
    y = jax.block_until_ready(crelu(x))
    ref = jnp.maximum(jnp.concatenate([x, -x], axis=-1), 0)
    assert y.shape == (2, 4, 16, 32), y.shape
    assert jnp.allclose(y, ref), "mismatch vs reference (packed / NCHW case)"

    # 2) Lane-dense case (W % 128 == 0) with an explicit multi-step row grid,
    #    exercising the tiled, double-buffered general path.
    x2 = jax.random.normal(k1, (4, 8, 256), dtype=jnp.float32)
    y2 = jax.block_until_ready(crelu(x2, tile_rows=8))
    ref2 = jnp.maximum(jnp.concatenate([x2, -x2], axis=-1), 0)
    assert y2.shape == (4, 8, 512), y2.shape
    assert jnp.allclose(y2, ref2), "mismatch vs reference (lane-dense case)"

    # 3) Odd width (neither divides nor is a multiple of 128): general
    #    fallback path with full-dim blocks.
    x3 = jax.random.normal(k2, (2, 3, 40), dtype=jnp.float32)
    y3 = jax.block_until_ready(crelu(x3))
    ref3 = jnp.maximum(jnp.concatenate([x3, -x3], axis=-1), 0)
    assert y3.shape == (2, 3, 80), y3.shape
    assert jnp.allclose(y3, ref3), "mismatch vs reference (odd-width case)"

    print("KERNEL_OK")
</pallas_src>

<mosaic_0001>
module attributes {stable_mosaic.version = 11 : i64} {
  func.func @kernel(%arg0: i32, %arg1: memref<16x128xf32, #tpu.memory_space<vmem>>, %arg2: memref<16x256xf32, #tpu.memory_space<vmem>>) attributes {dimension_semantics = [#tpu.dimension_semantics<parallel>], iteration_bounds = array<i64: 1>, scalar_prefetch = 0 : i64, scratch_operands = 0 : i64, tpu.core_type = #tpu.core_type<tc>, window_params = [{transform_indices = @transform_0, window_bounds = array<i64: 16, 128>}, {transform_indices = @transform_1, window_bounds = array<i64: 16, 256>}]} {
    %c0 = arith.constant 0 : index
    %c0_0 = arith.constant 0 : index
    %0 = vector.load %arg1[%c0, %c0_0] : memref<16x128xf32, #tpu.memory_space<vmem>>, vector<16x128xf32>
    %cst = arith.constant 0.000000e+00 : f32
    %1 = vector.broadcast %cst : f32 to vector<16x128xf32>
    %2 = arith.maximumf %0, %1 : vector<16x128xf32>
    %cst_1 = arith.constant 0.000000e+00 : f32
    %3 = vector.broadcast %cst_1 : f32 to vector<16x128xf32>
    %4 = arith.subf %3, %0 : vector<16x128xf32>
    %cst_2 = arith.constant 0.000000e+00 : f32
    %5 = vector.broadcast %cst_2 : f32 to vector<16x128xf32>
    %6 = arith.maximumf %4, %5 : vector<16x128xf32>
    %7 = vector.extract_strided_slice %2 {offsets = [0, 0], sizes = [16, 16], strides = [1, 1]} : vector<16x128xf32> to vector<16x16xf32>
    %8 = vector.extract_strided_slice %6 {offsets = [0, 0], sizes = [16, 16], strides = [1, 1]} : vector<16x128xf32> to vector<16x16xf32>
    %9 = vector.extract_strided_slice %2 {offsets = [0, 16], sizes = [16, 16], strides = [1, 1]} : vector<16x128xf32> to vector<16x16xf32>
    %10 = vector.extract_strided_slice %6 {offsets = [0, 16], sizes = [16, 16], strides = [1, 1]} : vector<16x128xf32> to vector<16x16xf32>
    %11 = vector.extract_strided_slice %2 {offsets = [0, 32], sizes = [16, 16], strides = [1, 1]} : vector<16x128xf32> to vector<16x16xf32>
    %12 = vector.extract_strided_slice %6 {offsets = [0, 32], sizes = [16, 16], strides = [1, 1]} : vector<16x128xf32> to vector<16x16xf32>
    %13 = vector.extract_strided_slice %2 {offsets = [0, 48], sizes = [16, 16], strides = [1, 1]} : vector<16x128xf32> to vector<16x16xf32>
    %14 = vector.extract_strided_slice %6 {offsets = [0, 48], sizes = [16, 16], strides = [1, 1]} : vector<16x128xf32> to vector<16x16xf32>
    %15 = vector.extract_strided_slice %2 {offsets = [0, 64], sizes = [16, 16], strides = [1, 1]} : vector<16x128xf32> to vector<16x16xf32>
    %16 = vector.extract_strided_slice %6 {offsets = [0, 64], sizes = [16, 16], strides = [1, 1]} : vector<16x128xf32> to vector<16x16xf32>
    %17 = vector.extract_strided_slice %2 {offsets = [0, 80], sizes = [16, 16], strides = [1, 1]} : vector<16x128xf32> to vector<16x16xf32>
    %18 = vector.extract_strided_slice %6 {offsets = [0, 80], sizes = [16, 16], strides = [1, 1]} : vector<16x128xf32> to vector<16x16xf32>
    %19 = vector.extract_strided_slice %2 {offsets = [0, 96], sizes = [16, 16], strides = [1, 1]} : vector<16x128xf32> to vector<16x16xf32>
    %20 = vector.extract_strided_slice %6 {offsets = [0, 96], sizes = [16, 16], strides = [1, 1]} : vector<16x128xf32> to vector<16x16xf32>
    %21 = vector.extract_strided_slice %2 {offsets = [0, 112], sizes = [16, 16], strides = [1, 1]} : vector<16x128xf32> to vector<16x16xf32>
    %22 = vector.extract_strided_slice %6 {offsets = [0, 112], sizes = [16, 16], strides = [1, 1]} : vector<16x128xf32> to vector<16x16xf32>
    %23 = tpu.concatenate %7, %8, %9, %10, %11, %12, %13, %14, %15, %16, %17, %18, %19, %20, %21, %22 in 1 : vector<16x16xf32>, vector<16x16xf32>, vector<16x16xf32>, vector<16x16xf32>, vector<16x16xf32>, vector<16x16xf32>, vector<16x16xf32>, vector<16x16xf32>, vector<16x16xf32>, vector<16x16xf32>, vector<16x16xf32>, vector<16x16xf32>, vector<16x16xf32>, vector<16x16xf32>, vector<16x16xf32>, vector<16x16xf32> -> vector<16x256xf32>
    %c0_3 = arith.constant 0 : index
    %c0_4 = arith.constant 0 : index
    %24 = vector.load %arg2[%c0_3, %c0_4] : memref<16x256xf32, #tpu.memory_space<vmem>>, vector<16x256xf32>
    tpu.vector_store %arg2[%c0_3, %c0_4], %23 {strides = array<i32>} : memref<16x256xf32, #tpu.memory_space<vmem>>, vector<16x256xf32>,
    return
  }
  func.func @transform_0(%arg0: i32) -> (i32, i32) {
    %c0_i32 = arith.constant 0 : i32
    %c0_i32_0 = arith.constant 0 : i32
    return %arg0, %c0_i32 : i32, i32
  }
  func.func @transform_1(%arg0: i32) -> (i32, i32) {
    %c0_i32 = arith.constant 0 : i32
    %c0_i32_0 = arith.constant 0 : i32
    return %arg0, %c0_i32 : i32, i32
  }
}

module attributes {stable_mosaic.version = 11 : i64} {
  func.func @_crelu_kernel_2d(%arg0: i32, %arg1: memref<64x16xf32, #tpu.memory_space<vmem>>, %arg2: memref<64x32xf32, #tpu.memory_space<vmem>>) attributes {dimension_semantics = [#tpu.dimension_semantics<parallel>], iteration_bounds = array<i64: 2>, scalar_prefetch = 0 : i64, scratch_operands = 0 : i64, tpu.core_type = #tpu.core_type<tc>, window_params = [{transform_indices = @transform_0, window_bounds = array<i64: 64, 16>}, {transform_indices = @transform_1, window_bounds = array<i64: 64, 32>}]} {
    %c0 = arith.constant 0 : index
    %c0_0 = arith.constant 0 : index
    %0 = vector.load %arg1[%c0, %c0_0] : memref<64x16xf32, #tpu.memory_space<vmem>>, vector<64x16xf32>
    %cst = arith.constant 0.000000e+00 : f32
    %1 = vector.broadcast %cst : f32 to vector<64x16xf32>
    %2 = arith.maximumf %0, %1 : vector<64x16xf32>
    %c0_1 = arith.constant 0 : index
    %c0_2 = arith.constant 0 : index
    %3 = vector.load %arg2[%c0_1, %c0_2] : memref<64x32xf32, #tpu.memory_space<vmem>>, vector<64x16xf32>
    tpu.vector_store %arg2[%c0_1, %c0_2], %2 {strides = array<i32>} : memref<64x32xf32, #tpu.memory_space<vmem>>, vector<64x16xf32>,
    %cst_3 = arith.constant 0.000000e+00 : f32
    %4 = vector.broadcast %cst_3 : f32 to vector<64x16xf32>
    %5 = arith.subf %4, %0 : vector<64x16xf32>
    %cst_4 = arith.constant 0.000000e+00 : f32
    %6 = vector.broadcast %cst_4 : f32 to vector<64x16xf32>
    %7 = arith.maximumf %5, %6 : vector<64x16xf32>
    %c0_5 = arith.constant 0 : index
    %c16 = arith.constant 16 : index
    %8 = vector.load %arg2[%c0_5, %c16] : memref<64x32xf32, #tpu.memory_space<vmem>>, vector<64x16xf32>
    tpu.vector_store %arg2[%c0_5, %c16], %7 {strides = array<i32>} : memref<64x32xf32, #tpu.memory_space<vmem>>, vector<64x16xf32>,
    return
  }
  func.func @transform_0(%arg0: i32) -> (i32, i32) {
    %c0_i32 = arith.constant 0 : i32
    %c0_i32_0 = arith.constant 0 : i32
    return %arg0, %c0_i32 : i32, i32
  }
  func.func @transform_1(%arg0: i32) -> (i32, i32) {
    %c0_i32 = arith.constant 0 : i32
    %c0_i32_0 = arith.constant 0 : i32
    return %arg0, %c0_i32 : i32, i32
  }
}

</mosaic_0001>

<bundles_post_ra>
// kernel: tpu_custom_call.1
= control target key start
LH: loop header
LB: loop body
LE: loop exit
PB: predicated region body
PF: predicated region fallthrough
CT: control target
= control target key end

     0   :  { %6 = vsyncpa [#allocation3], 0  ;;  %s354_s0 = inlined_call_operand.hbm [shape: f32[16,128], index: 0, kind: input, shape index: {}]   ;;  %s355_s1 = inlined_call_operand.hbm [shape: f32[16,256], index: 1, kind: output, shape index: {}]  }
   0x1   :  { %7 = vsyncpa [#allocation4], 0  ;;  %s235_s6 = smov [#allocation2]   ;;  %s187_s10 = scalar_lea.hbm %s354_s0, 256 }
   0x2   :  { %s13_s7 = sshll.u32 %s235_s6, 4  ;;  %p188_p0 = scmp.ne.s32.totalorder %s354_s0, %s187_s10  ;;  %s14_s7 = int_to_ptr.vmem [resolvable:$true] %s13_s7 }
   0x3   :  { %p191_p1 = scmp.lt.u32.totalorder %s187_s10, %s354_s0 }
   0x5   :  { %p193_p2 = pnand %p191_p1, %p188_p0 }
   0x7   :  { %196 = shalt.err (!%p193_p2)
}
   0x8   :  { %s197_s15 = scalar_lea.vmem %s14_s7, 256  ;;  %p202_p4 = scmp.lt.s32.totalorder %s14_s7, %s14_s7 }
   0x9   :  { %p198_p3 = scmp.ne.s32.totalorder %s14_s7, %s197_s15  ;;  %p203_p5 = scmp.lt.s32.totalorder %s197_s15, %s197_s15 }
   0xb   :  { %p204_p6 = por %p203_p5, %p202_p4 }
   0xd   :  { %p205_p7 = pnand %p204_p6, %p198_p3 }
   0xf   :  { %208 = shalt.err (!%p205_p7)
}
  0x10   :  { %s236_s16 = smov 128   ;;  %s237_s17 = smov 8  }
  0x11   :  { %19 = dma.hbm_to_vmem [thread:$0]  %s354_s0, 256, %s14_s7, [#allocation3], %s236_s16, %s236_s16, %s237_s17  }
  0x12   :  { %231 = dma.done.wait [#allocation3], 256  }
  0x13   :  { %232 = vsyncadd [#allocation3], 4294967040  ;;  %v23_v0 = vld [vmem:[#allocation2] sm:$0xff]  ;;  %v24_v1 = vld [vmem:[#allocation2 + $0x8] sm:$0xff]  ;;  %s238_s20 = smov 16   ;;  %s239_s21 = smov 64  }
  0x14   :  { %v269_v2 = vmax.f32 %v23_v0, 0.0  ;;  %v27_v3 = vsub.f32 0.0, %v23_v0  ;;  %v277_v5 = vmax.f32 %v24_v1, 0.0  ;;  %v28_v6 = vsub.f32 0.0, %v24_v1  ;;  %s240_s0 = smov 80   ;;  %s241_s22 = smov 32  }
  0x15   :  { %s242_s23 = smov 96   ;;  %s243_s24 = smov 48   ;;  %vm119_vm0 = vcmask 130048   ;;  %vm122_vm1 = vcmask 261120   ;;  %vm125_vm2 = vcmask 392192   ;;  %vm128_vm3 = vcmask 523264  }
  0x16   :  { %41 = vrot.lane.b32.xlu0 %v269_v2, %s238_s20  ;;  %77 = vrot.lane.b32.xlu1 %v269_v2, %s239_s21  ;;  %v275_v4 = vmax.f32 %v27_v3, 0.0  ;;  %v283_v7 = vmax.f32 %v28_v6, 0.0  ;;  %s244_s25 = smov 112   ;;  %vm131_vm4 = vcmask 654336   ;;  %vm134_vm5 = vcmask 785408   ;;  %s245_s26 = smov [#allocation5]  }
  0x17   :  { %vm137_vm6 = vcmask 916480   ;;  %s163_s27 = sshll.u32 %s245_s26, 4  ;;  %s164_s27 = int_to_ptr.vmem [resolvable:$true] %s163_s27 }
  0x18   :  { %s209_s28 = scalar_lea.vmem %s164_s27, 512  ;;  %p214_p9 = scmp.lt.s32.totalorder %s164_s27, %s164_s27 }
  0x19   :  { %p210_p8 = scmp.ne.s32.totalorder %s164_s27, %s209_s28  ;;  %p215_p10 = scmp.lt.s32.totalorder %s209_s28, %s209_s28 }
  0x1a   :  { %33 = vrot.lane.b32.xlu0 %v275_v4, %s238_s20  ;;  %79 = vrot.lane.b32.xlu1 %v277_v5, %s239_s21 }
  0x1b   :  { %p216_p11 = por %p215_p10, %p214_p9 }
  0x1d   :  { %p217_p12 = pnand %p216_p11, %p210_p8 }
  0x1e   :  { %35 = vrot.lane.b32.xlu0 %v283_v7, %s238_s20  ;;  %43 = vrot.lane.b32.xlu1 %v277_v5, %s238_s20 }
  0x22   :  { %83 = vrot.lane.b32.xlu0 %v275_v4, %s240_s0  ;;  %85 = vrot.lane.b32.xlu1 %v283_v7, %s240_s0 }
  0x26   :  { %89 = vrot.lane.b32.xlu0 %v269_v2, %s240_s0  ;;  %91 = vrot.lane.b32.xlu1 %v277_v5, %s240_s0 }
  0x2a   :  { %47 = vrot.lane.b32.xlu0 %v275_v4, %s241_s22  ;;  %49 = vrot.lane.b32.xlu1 %v283_v7, %s241_s22 }
  0x2e   :  { %95 = vrot.lane.b32.xlu0 %v275_v4, %s242_s23  ;;  %97 = vrot.lane.b32.xlu1 %v283_v7, %s242_s23 }
  0x32   :  { %53 = vrot.lane.b32.xlu0 %v269_v2, %s241_s22  ;;  %55 = vrot.lane.b32.xlu1 %v277_v5, %s241_s22 }
  0x36   :  { %101 = vrot.lane.b32.xlu0 %v269_v2, %s242_s23  ;;  %103 = vrot.lane.b32.xlu1 %v277_v5, %s242_s23 }
  0x3a   :  { %59 = vrot.lane.b32.xlu0 %v275_v4, %s243_s24  ;;  %61 = vrot.lane.b32.xlu1 %v283_v7, %s243_s24 }
  0x3e   :  { %107 = vrot.lane.b32.xlu0 %v275_v4, %s244_s25  ;;  %109 = vrot.lane.b32.xlu1 %v283_v7, %s244_s25 }
  0x42   :  { %65 = vrot.lane.b32.xlu0 %v269_v2, %s243_s24  ;;  %67 = vrot.lane.b32.xlu1 %v277_v5, %s243_s24 }
  0x46   :  { %113 = vrot.lane.b32.xlu0 %v269_v2, %s244_s25  ;;  %115 = vrot.lane.b32.xlu1 %v277_v5, %s244_s25 }
  0x4a   :  { %71 = vrot.lane.b32.xlu0 %v275_v4, %s239_s21  ;;  %73 = vrot.lane.b32.xlu1 %v283_v7, %s239_s21 }
  0x88   :  { %v42_v8 = vpop.permute.xlu0 %41  ;;  %v78_v9 = vpop.permute.xlu1 %77 }
  0x8c   :  { %v34_v10 = vpop.permute.xlu0 %33  ;;  %v80_v11 = vpop.permute.xlu1 %79 }
  0x8d   :  { %v120_v34 = vsel %vm119_vm0, %v269_v2, %v34_v10 }
  0x8e   :  { %v123_v43 = vsel %vm122_vm1, %v120_v34, %v42_v8 }
  0x90   :  { %v36_v12 = vpop.permute.xlu0 %35  ;;  %v44_v13 = vpop.permute.xlu1 %43 }
  0x91   :  { %v121_v35 = vsel %vm119_vm0, %v277_v5, %v36_v12 }
  0x92   :  { %v124_v42 = vsel %vm122_vm1, %v121_v35, %v44_v13 }
  0x94   :  { %v84_v14 = vpop.permute.xlu0 %83  ;;  %v86_v15 = vpop.permute.xlu1 %85 }
  0x95   :  { %v140_v30 = vsel %vm119_vm0, %v78_v9, %v84_v14  ;;  %v141_v31 = vsel %vm119_vm0, %v80_v11, %v86_v15 }
  0x98   :  { %v90_v16 = vpop.permute.xlu0 %89  ;;  %v92_v17 = vpop.permute.xlu1 %91 }
  0x99   :  { %v142_v36 = vsel %vm122_vm1, %v140_v30, %v90_v16  ;;  %v143_v37 = vsel %vm122_vm1, %v141_v31, %v92_v17 }
  0x9c   :  { %v48_v18 = vpop.permute.xlu0 %47  ;;  %v50_v19 = vpop.permute.xlu1 %49 }
  0x9d   :  { %v126_v48 = vsel %vm125_vm2, %v123_v43, %v48_v18  ;;  %v127_v49 = vsel %vm125_vm2, %v124_v42, %v50_v19 }
  0xa0   :  { %v96_v20 = vpop.permute.xlu0 %95  ;;  %v98_v21 = vpop.permute.xlu1 %97 }
  0xa1   :  { %v144_v38 = vsel %vm125_vm2, %v142_v36, %v96_v20  ;;  %v145_v39 = vsel %vm125_vm2, %v143_v37, %v98_v21 }
  0xa4   :  { %v54_v22 = vpop.permute.xlu0 %53  ;;  %v56_v23 = vpop.permute.xlu1 %55 }
  0xa5   :  { %v129_v52 = vsel %vm128_vm3, %v126_v48, %v54_v22  ;;  %v130_v53 = vsel %vm128_vm3, %v127_v49, %v56_v23 }
  0xa8   :  { %v102_v24 = vpop.permute.xlu0 %101  ;;  %v104_v25 = vpop.permute.xlu1 %103 }
  0xa9   :  { %v146_v40 = vsel %vm128_vm3, %v144_v38, %v102_v24  ;;  %v147_v41 = vsel %vm128_vm3, %v145_v39, %v104_v25 }
  0xac   :  { %v60_v26 = vpop.permute.xlu0 %59  ;;  %v62_v27 = vpop.permute.xlu1 %61 }
  0xad   :  { %v132_v56 = vsel %vm131_vm4, %v129_v52, %v60_v26  ;;  %v133_v57 = vsel %vm131_vm4, %v130_v53, %v62_v27 }
  0xb0   :  { %v108_v28 = vpop.permute.xlu0 %107  ;;  %v110_v29 = vpop.permute.xlu1 %109 }
  0xb1   :  { %v148_v44 = vsel %vm131_vm4, %v146_v40, %v108_v28  ;;  %v149_v45 = vsel %vm131_vm4, %v147_v41, %v110_v29 }
  0xb4   :  { %v66_v32 = vpop.permute.xlu0 %65  ;;  %v68_v33 = vpop.permute.xlu1 %67 }
  0xb5   :  { %v135_v58 = vsel %vm134_vm5, %v132_v56, %v66_v32  ;;  %v136_v59 = vsel %vm134_vm5, %v133_v57, %v68_v33 }
  0xb8   :  { %v114_v46 = vpop.permute.xlu0 %113  ;;  %v116_v47 = vpop.permute.xlu1 %115 }
  0xb9   :  { %v150_v50 = vsel %vm134_vm5, %v148_v44, %v114_v46  ;;  %v151_v51 = vsel %vm134_vm5, %v149_v45, %v116_v47 }
  0xba   :  { %v152_v54 = vsel %vm137_vm6, %v150_v50, %v275_v4  ;;  %v153_v55 = vsel %vm137_vm6, %v151_v51, %v283_v7 }
  0xbb   :  { %155 = vst [vmem:[#allocation5 + $0x8] sm:$0xff] %v152_v54  ;;  %157 = vst [vmem:[#allocation5 + $0x18] sm:$0xff] %v153_v55 }
  0xbc   :  { %v72_v60 = vpop.permute.xlu0 %71  ;;  %v74_v61 = vpop.permute.xlu1 %73 }
  0xbd   :  { %v138_v62 = vsel %vm137_vm6, %v135_v58, %v72_v60  ;;  %v139_v63 = vsel %vm137_vm6, %v136_v59, %v74_v61 }
  0xbe   :  { %154 = vst [vmem:[#allocation5] sm:$0xff] %v138_v62  ;;  %156 = vst [vmem:[#allocation5 + $0x10] sm:$0xff] %v139_v63 }
  0xbf   :  { %220 = shalt.err (!%p217_p12)
}
  0xc0   :  { %s221_s2 = scalar_lea.hbm %s355_s1, 512 }
  0xc1   :  { %p222_p13 = scmp.ne.s32.totalorder %s355_s1, %s221_s2  ;;  %p225_p0 = scmp.lt.u32.totalorder %s221_s2, %s355_s1 }
  0xc3   :  { %p227_p1 = pnand %p225_p0, %p222_p13 }
  0xc5   :  { %230 = shalt.err (!%p227_p1)
}
  0xc6   :  { %s246_s7 = smov 256  }
  0xc7   :  { %169 = dma.vmem_to_hbm [thread:$0]  %s164_s27, 512, %s355_s1, [#allocation4], %s246_s7, %s246_s7, %s238_s20  }
  0xc8   :  { %233 = dma.done.wait [#allocation4], 512  }
  0xc9   :  { %234 = vsyncadd [#allocation4], 4294966784 }
  0xca   :  { %173 = vsyncpa [#allocation3], 1 }
  0xcb   :  { %174 = vsyncpa [#allocation4], 1 }

// kernel: tpu_custom_call.1
= control target key start
LH: loop header
LB: loop body
LE: loop exit
PB: predicated region body
PF: predicated region fallthrough
CT: control target
= control target key end

     0   :  { %s297_s6 = smov 0   ;;  %s348_s0 = inlined_call_operand.vmem [shape: f32[128,16], index: 0, kind: input, shape index: {}]   ;;  %s349_s1 = inlined_call_operand.vmem [shape: f32[128,32], index: 1, kind: output, shape index: {}]  }
   0x1 LB: > { %s258_s7 = sadd.s32 4294967295, %s284_s6   ;;  %p262_p0 = scmp.ge.s32.totalorder %s284_s6, 1  ;;  %s284_s6 = sphi %s297_s6, %s11_s6  }
   0x2   : > { %p88_p1 = scmp.lt.s32.totalorder %s284_s6, 3 }
   0x4   : > { %p89_p2 = pnand %p262_p0, %p88_p1 }
   0x5   : > { %s263_s8 = sshll.u32 (!%p89_p2), %s258_s7, 3  ;;  %vm136_vm0 = vcmask (!%p89_p2), 130048   ;;  %s286_s16 = smov (!%p89_p2), 16   ;;  %vm193_vm1 = vcmask (!%p89_p2), 261248  }
   0x6   : > { %92 = sbr.rel (%p89_p2) target bundleno = 149 (0x95), region = 24  ;;  %p109_p3 = scmp.lt.s32.totalorder (!%p89_p2), %s263_s8, 15 }
   0xd   : > { %s351_s8 = smov (!%p109_p3, %s263_s8), 15 }
   0xe   : > { %s264_s9 = sshll.u32 %s351_s8, 3 }
   0xf   : > { %s112_s12 = scalar_lea.vmem %s348_s0, %s264_s9  ;;  %s311_s15 = scalar_lea.vmem %s349_s1, %s264_s9 }
  0x10   : > { %v122_v0 = vld [vmem:[%s112_s12 + $0x10] sm:$0xff]  ;;  %v120_v1 = vld [vmem:[%s112_s12] sm:$0xff]  ;;  %v123_v2 = vld [vmem:[%s112_s12 + $0x18] sm:$0xff] }
  0x11   : > { %v147_v3 = vsub.f32 0.0, %v122_v0  ;;  %v130_v4 = vmax.f32 %v122_v0, 0.0  ;;  %v145_v5 = vsub.f32 0.0, %v120_v1  ;;  %v128_v6 = vmax.f32 %v120_v1, 0.0  ;;  %v121_v7 = vld [vmem:[%s112_s12 + $0x8] sm:$0xff]  ;;  %v124_v13 = vld [vmem:[%s112_s12 + $0x20] sm:$0xff] }
  0x12   : > { %v125_v8 = vld [vmem:[%s112_s12 + $0x28] sm:$0xff]  ;;  %v131_v9 = vmax.f32 %v123_v2, 0.0  ;;  %v148_v10 = vsub.f32 0.0, %v123_v2  ;;  %v129_v11 = vmax.f32 %v121_v7, 0.0  ;;  %v146_v12 = vsub.f32 0.0, %v121_v7  ;;  %v127_v20 = vld [vmem:[%s112_s12 + $0x38] sm:$0xff] }
  0x13   : > { %v155_v14 = vmax.f32 %v147_v3, 0.0  ;;  %v153_v15 = vmax.f32 %v145_v5, 0.0  ;;  %v133_v16 = vmax.f32 %v125_v8, 0.0  ;;  %139 = vst.msk [vmem:[%s311_s15 + $0x10] sm:$0xff] %vm136_vm0, %v130_v4  ;;  %137 = vst.msk [vmem:[%s311_s15] sm:$0xff] %vm136_vm0, %v128_v6  ;;  %v150_v18 = vsub.f32 0.0, %v125_v8 }
  0x14   : > { %v156_v17 = vmax.f32 %v148_v10, 0.0  ;;  %v132_v19 = vmax.f32 %v124_v13, 0.0  ;;  %v126_v21 = vld [vmem:[%s112_s12 + $0x30] sm:$0xff]  ;;  %138 = vst.msk [vmem:[%s311_s15 + $0x8] sm:$0xff] %vm136_vm0, %v129_v11  ;;  %140 = vst.msk [vmem:[%s311_s15 + $0x18] sm:$0xff] %vm136_vm0, %v131_v9  ;;  %v154_v22 = vmax.f32 %v146_v12, 0.0 }
  0x15   : > { %173 = vrot.lane.b32.xlu1 %v155_v14, %s286_s16  ;;  %169 = vrot.lane.b32.xlu0 %v153_v15, %s286_s16  ;;  %v149_v23 = vsub.f32 0.0, %v124_v13  ;;  %v135_v24 = vmax.f32 %v127_v20, 0.0  ;;  %v134_v25 = vmax.f32 %v126_v21, 0.0  ;;  %142 = vst.msk [vmem:[%s311_s15 + $0x28] sm:$0xff] %vm136_vm0, %v133_v16  ;;  %v158_v26 = vmax.f32 %v150_v18, 0.0 }
  0x16   : > { %141 = vst.msk [vmem:[%s311_s15 + $0x20] sm:$0xff] %vm136_vm0, %v132_v19  ;;  %v152_v28 = vsub.f32 0.0, %v127_v20  ;;  %v151_v29 = vsub.f32 0.0, %v126_v21 }
  0x17   : > { %143 = vst.msk [vmem:[%s311_s15 + $0x30] sm:$0xff] %vm136_vm0, %v134_v25  ;;  %144 = vst.msk [vmem:[%s311_s15 + $0x38] sm:$0xff] %vm136_vm0, %v135_v24  ;;  %v157_v27 = vmax.f32 %v149_v23, 0.0 }
  0x18   : > { %v160_v30 = vmax.f32 %v152_v28, 0.0  ;;  %v159_v31 = vmax.f32 %v151_v29, 0.0 }
  0x19   : > { %175 = vrot.lane.b32.xlu1 %v156_v17, %s286_s16  ;;  %171 = vrot.lane.b32.xlu0 %v154_v22, %s286_s16 }
  0x1d   : > { %179 = vrot.lane.b32.xlu1 %v158_v26, %s286_s16  ;;  %177 = vrot.lane.b32.xlu0 %v157_v27, %s286_s16 }
  0x21   : > { %183 = vrot.lane.b32.xlu1 %v160_v30, %s286_s16  ;;  %181 = vrot.lane.b32.xlu0 %v159_v31, %s286_s16 }
  0x87   : > { %v174_v32 = vpop.permute.xlu1 %173  ;;  %v170_v33 = vpop.permute.xlu0 %169 }
  0x88   : > { %196 = vst.msk [vmem:[%s311_s15 + $0x10] sm:$0xff] %vm193_vm1, %v174_v32  ;;  %194 = vst.msk [vmem:[%s311_s15] sm:$0xff] %vm193_vm1, %v170_v33 }
  0x8b   : > { %v176_v34 = vpop.permute.xlu1 %175  ;;  %v172_v35 = vpop.permute.xlu0 %171 }
  0x8c   : > { %197 = vst.msk [vmem:[%s311_s15 + $0x18] sm:$0xff] %vm193_vm1, %v176_v34  ;;  %195 = vst.msk [vmem:[%s311_s15 + $0x8] sm:$0xff] %vm193_vm1, %v172_v35 }
  0x8f   : > { %v180_v36 = vpop.permute.xlu1 %179  ;;  %v178_v37 = vpop.permute.xlu0 %177 }
  0x90   : > { %199 = vst.msk [vmem:[%s311_s15 + $0x28] sm:$0xff] %vm193_vm1, %v180_v36  ;;  %198 = vst.msk [vmem:[%s311_s15 + $0x20] sm:$0xff] %vm193_vm1, %v178_v37 }
  0x93   : > { %v184_v38 = vpop.permute.xlu1 %183  ;;  %v182_v39 = vpop.permute.xlu0 %181 }
  0x94   : > { %201 = vst.msk [vmem:[%s311_s15 + $0x38] sm:$0xff] %vm193_vm1, %v184_v38  ;;  %200 = vst.msk [vmem:[%s311_s15 + $0x30] sm:$0xff] %vm193_vm1, %v182_v39 }
  0x95 PF: > { %s11_s6 = sadd.s32 1, %s284_s6  }
  0x96   : > { %p8_p4 = scmp.ge.s32.totalorder %s11_s6, 4  }
  0x98   :  { %10 = sbr.rel (!%p8_p4) target bundleno = 1 (0x1), region = 54 }

</bundles_post_ra>
